<compile_context>
chip_gen: v5e
topology: v5e:2x2
jax: 0.10.0
libtpu: 0.0.40
codegen_flags: <defaults>
</compile_context>

<pallas_src>
import jax
import jax.numpy as jnp
from jax.experimental import pallas as pl
from jax.experimental.pallas import tpu as pltpu


def _round_up(x, m):
    return ((x + m - 1) // m) * m


def zdecoder_kernel(x_ref, w1_ref, b1_ref, w2_ref, b2_ref, w3_ref, b3_ref, o_ref):
    """Whole MLP (3 matmuls + biases + ReLUs) on one VMEM-resident M-tile."""
    # bf16 operands -> native MXU bf16 path; f32 accumulation; f32 elementwise.
    x = x_ref[...].astype(jnp.bfloat16)

    h1 = jnp.dot(x, w1_ref[...], preferred_element_type=jnp.float32) + b1_ref[...]
    h1 = jnp.maximum(h1, 0.0)

    h2 = jnp.dot(h1.astype(jnp.bfloat16), w2_ref[...],
                 preferred_element_type=jnp.float32) + b2_ref[...]
    h2 = jnp.maximum(h2, 0.0)

    out = jnp.dot(h2.astype(jnp.bfloat16), w3_ref[...],
                  preferred_element_type=jnp.float32) + b3_ref[...]
    o_ref[...] = out.astype(o_ref.dtype)


def zdecoder_forward(x, params, curr_robot_id=None):
    """x: (B, num_inputs) f32. Returns (B, num_outputs) f32. curr_robot_id unused."""
    del curr_robot_id  # matches the torch module: argument is ignored.
    w1, b1, w2, b2, w3, b3 = params
    B, num_inputs = x.shape
    h1_dim = w1.shape[1]          # 128
    h2_dim = w2.shape[1]          # 256
    num_outputs = w3.shape[1]

    # Lane-pad the last layer's output dim to a multiple of 128 (zero columns are exact).
    out_pad = _round_up(num_outputs, 128)
    w3p = jnp.pad(w3, ((0, 0), (0, out_pad - num_outputs)))
    b3p = jnp.pad(b3, ((0, 0), (0, out_pad - num_outputs)))

    # Sublane-pad the batch; tile M if the batch is large. Weights stay resident
    # across grid steps (index_map pins them to block (0, 0)).
    tile_m = 128 if B >= 128 else _round_up(B, 8)
    b_pad = _round_up(B, tile_m)
    xp = jnp.pad(x, ((0, b_pad - B), (0, 0)))

    # bf16 weights: half the DMA bytes, native MXU path. Biases stay f32.
    w1b = w1.astype(jnp.bfloat16)
    w2b = w2.astype(jnp.bfloat16)
    w3b = w3p.astype(jnp.bfloat16)

    grid = (b_pad // tile_m,)

    flops = 2 * b_pad * (num_inputs * h1_dim + h1_dim * h2_dim + h2_dim * out_pad)
    bytes_accessed = (
        xp.size * 4 + w1b.size * 2 + w2b.size * 2 + w3b.size * 2
        + b1.size * 4 + b2.size * 4 + b3p.size * 4 + b_pad * out_pad * 4
    )

    out = pl.pallas_call(
        zdecoder_kernel,
        out_shape=jax.ShapeDtypeStruct((b_pad, out_pad), jnp.float32),
        grid_spec=pltpu.PrefetchScalarGridSpec(
            num_scalar_prefetch=0,
            grid=grid,
            in_specs=[
                pl.BlockSpec((tile_m, num_inputs), lambda i: (i, 0)),   # x tile
                pl.BlockSpec((num_inputs, h1_dim), lambda i: (0, 0)),   # w1
                pl.BlockSpec((1, h1_dim), lambda i: (0, 0)),            # b1
                pl.BlockSpec((h1_dim, h2_dim), lambda i: (0, 0)),       # w2
                pl.BlockSpec((1, h2_dim), lambda i: (0, 0)),            # b2
                pl.BlockSpec((h2_dim, out_pad), lambda i: (0, 0)),      # w3 (padded)
                pl.BlockSpec((1, out_pad), lambda i: (0, 0)),           # b3 (padded)
            ],
            out_specs=pl.BlockSpec((tile_m, out_pad), lambda i: (i, 0)),
        ),
        compiler_params=pltpu.CompilerParams(
            dimension_semantics=("parallel",),
        ),
        cost_estimate=pl.CostEstimate(
            flops=flops, transcendentals=0, bytes_accessed=bytes_accessed),
    )(xp, w1b, b1, w2b, b2, w3b, b3p)

    # Slice padded rows / lanes back off.
    return out[:B, :num_outputs]


def init_params(key, num_inputs, num_outputs):
    """Deterministic synthetic parameters (same shapes as the PyTorch module)."""
    ks = jax.random.split(key, 6)
    dims = [(num_inputs, 128), (128, 256), (256, num_outputs)]
    params = []
    for i, (din, dout) in enumerate(dims):
        scale = 1.0 / jnp.sqrt(jnp.float32(din))
        w = jax.random.uniform(ks[2 * i], (din, dout), jnp.float32, -scale, scale)
        b = jax.random.uniform(ks[2 * i + 1], (1, dout), jnp.float32, -scale, scale)
        params += [w, b]
    return tuple(params)


def reference_forward(x, params):
    w1, b1, w2, b2, w3, b3 = params
    h1 = jnp.maximum(x @ w1 + b1, 0.0)
    h2 = jnp.maximum(h1 @ w2 + b2, 0.0)
    return h2 @ w3 + b3


if __name__ == "__main__":
    num_inputs = 32
    num_outputs = 16
    batch = 2

    key = jax.random.PRNGKey(0)
    k_x, k_p = jax.random.split(key)
    x = jax.random.normal(k_x, (batch, num_inputs), jnp.float32)
    curr_robot_id = jnp.zeros((batch, 1), jnp.int32)  # unused, mirrors the torch signature

    params = init_params(k_p, num_inputs, num_outputs)

    out = zdecoder_forward(x, params, curr_robot_id)
    out = jax.block_until_ready(out)

    ref = reference_forward(x, params)
    assert out.shape == (batch, num_outputs)
    # bf16 MXU operands (f32 accumulation) -> loosened tolerance vs the f32 reference.
    assert jnp.allclose(out, ref, atol=1e-2, rtol=1e-2), (
        f"mismatch vs reference, max abs diff={jnp.max(jnp.abs(out - ref))}")

    print("KERNEL_OK")
</pallas_src>

<mosaic_0001>
module attributes {stable_mosaic.version = 11 : i64} {
  func.func @zdecoder_kernel(%arg0: i32, %arg1: memref<8x32xf32, #tpu.memory_space<vmem>>, %arg2: memref<32x128xbf16, #tpu.memory_space<vmem>>, %arg3: memref<1x128xf32, #tpu.memory_space<vmem>>, %arg4: memref<128x256xbf16, #tpu.memory_space<vmem>>, %arg5: memref<1x256xf32, #tpu.memory_space<vmem>>, %arg6: memref<256x128xbf16, #tpu.memory_space<vmem>>, %arg7: memref<1x128xf32, #tpu.memory_space<vmem>>, %arg8: memref<8x128xf32, #tpu.memory_space<vmem>>) attributes {dimension_semantics = [#tpu.dimension_semantics<parallel>], iteration_bounds = array<i64: 1>, scalar_prefetch = 0 : i64, scratch_operands = 0 : i64, tpu.core_type = #tpu.core_type<tc>, window_params = [{transform_indices = @transform_0, window_bounds = array<i64: 8, 32>}, {pipeline_mode = #tpu.pipeline_mode<synchronous>, transform_indices = @transform_1, window_bounds = array<i64: 32, 128>}, {pipeline_mode = #tpu.pipeline_mode<synchronous>, transform_indices = @transform_2, window_bounds = array<i64: 1, 128>}, {pipeline_mode = #tpu.pipeline_mode<synchronous>, transform_indices = @transform_3, window_bounds = array<i64: 128, 256>}, {pipeline_mode = #tpu.pipeline_mode<synchronous>, transform_indices = @transform_4, window_bounds = array<i64: 1, 256>}, {pipeline_mode = #tpu.pipeline_mode<synchronous>, transform_indices = @transform_5, window_bounds = array<i64: 256, 128>}, {pipeline_mode = #tpu.pipeline_mode<synchronous>, transform_indices = @transform_6, window_bounds = array<i64: 1, 128>}, {transform_indices = @transform_7, window_bounds = array<i64: 8, 128>}]} {
    %c0 = arith.constant 0 : index
    %c0_0 = arith.constant 0 : index
    %0 = vector.load %arg1[%c0, %c0_0] : memref<8x32xf32, #tpu.memory_space<vmem>>, vector<8x32xf32>
    %1 = arith.truncf %0 : vector<8x32xf32> to vector<8x32xbf16>
    %c0_1 = arith.constant 0 : index
    %c0_2 = arith.constant 0 : index
    %2 = vector.load %arg2[%c0_1, %c0_2] : memref<32x128xbf16, #tpu.memory_space<vmem>>, vector<32x128xbf16>
    %cst = arith.constant dense<0.000000e+00> : vector<8x128xf32>
    %3 = tpu.matmul %1, %2, %cst {dimension_numbers = #tpu.dot_dimension_numbers<[1], [0], [0], [1], [0, 0, 1, 1], [], []>} : vector<8x32xbf16>, vector<32x128xbf16>, vector<8x128xf32> -> vector<8x128xf32>
    %c0_3 = arith.constant 0 : index
    %c0_4 = arith.constant 0 : index
    %4 = vector.load %arg3[%c0_3, %c0_4] : memref<1x128xf32, #tpu.memory_space<vmem>>, vector<1x128xf32>
    %5 = vector.broadcast %4 : vector<1x128xf32> to vector<8x128xf32>
    %6 = arith.addf %3, %5 : vector<8x128xf32>
    %cst_5 = arith.constant 0.000000e+00 : f32
    %7 = vector.broadcast %cst_5 : f32 to vector<8x128xf32>
    %8 = arith.maximumf %6, %7 : vector<8x128xf32>
    %9 = arith.truncf %8 : vector<8x128xf32> to vector<8x128xbf16>
    %c0_6 = arith.constant 0 : index
    %c0_7 = arith.constant 0 : index
    %10 = vector.load %arg4[%c0_6, %c0_7] : memref<128x256xbf16, #tpu.memory_space<vmem>>, vector<128x256xbf16>
    %cst_8 = arith.constant dense<0.000000e+00> : vector<8x256xf32>
    %11 = tpu.matmul %9, %10, %cst_8 {dimension_numbers = #tpu.dot_dimension_numbers<[1], [0], [0], [1], [0, 0, 1, 1], [], []>} : vector<8x128xbf16>, vector<128x256xbf16>, vector<8x256xf32> -> vector<8x256xf32>
    %c0_9 = arith.constant 0 : index
    %c0_10 = arith.constant 0 : index
    %12 = vector.load %arg5[%c0_9, %c0_10] : memref<1x256xf32, #tpu.memory_space<vmem>>, vector<1x256xf32>
    %13 = vector.broadcast %12 : vector<1x256xf32> to vector<8x256xf32>
    %14 = arith.addf %11, %13 : vector<8x256xf32>
    %cst_11 = arith.constant 0.000000e+00 : f32
    %15 = vector.broadcast %cst_11 : f32 to vector<8x256xf32>
    %16 = arith.maximumf %14, %15 : vector<8x256xf32>
    %17 = arith.truncf %16 : vector<8x256xf32> to vector<8x256xbf16>
    %c0_12 = arith.constant 0 : index
    %c0_13 = arith.constant 0 : index
    %18 = vector.load %arg6[%c0_12, %c0_13] : memref<256x128xbf16, #tpu.memory_space<vmem>>, vector<256x128xbf16>
    %cst_14 = arith.constant dense<0.000000e+00> : vector<8x128xf32>
    %19 = tpu.matmul %17, %18, %cst_14 {dimension_numbers = #tpu.dot_dimension_numbers<[1], [0], [0], [1], [0, 0, 1, 1], [], []>} : vector<8x256xbf16>, vector<256x128xbf16>, vector<8x128xf32> -> vector<8x128xf32>
    %c0_15 = arith.constant 0 : index
    %c0_16 = arith.constant 0 : index
    %20 = vector.load %arg7[%c0_15, %c0_16] : memref<1x128xf32, #tpu.memory_space<vmem>>, vector<1x128xf32>
    %21 = vector.broadcast %20 : vector<1x128xf32> to vector<8x128xf32>
    %22 = arith.addf %19, %21 : vector<8x128xf32>
    %c0_17 = arith.constant 0 : index
    %c0_18 = arith.constant 0 : index
    %23 = vector.load %arg8[%c0_17, %c0_18] : memref<8x128xf32, #tpu.memory_space<vmem>>, vector<8x128xf32>
    tpu.vector_store %arg8[%c0_17, %c0_18], %22 {strides = array<i32>} : memref<8x128xf32, #tpu.memory_space<vmem>>, vector<8x128xf32>,
    return
  }
  func.func @transform_0(%arg0: i32) -> (i32, i32) {
    %c0_i32 = arith.constant 0 : i32
    %c0_i32_0 = arith.constant 0 : i32
    return %arg0, %c0_i32 : i32, i32
  }
  func.func @transform_1(%arg0: i32) -> (i32, i32) {
    %c0_i32 = arith.constant 0 : i32
    %c0_i32_0 = arith.constant 0 : i32
    %c0_i32_1 = arith.constant 0 : i32
    return %c0_i32, %c0_i32_0 : i32, i32
  }
  func.func @transform_2(%arg0: i32) -> (i32, i32) {
    %c0_i32 = arith.constant 0 : i32
    %c0_i32_0 = arith.constant 0 : i32
    %c0_i32_1 = arith.constant 0 : i32
    return %c0_i32, %c0_i32_0 : i32, i32
  }
  func.func @transform_3(%arg0: i32) -> (i32, i32) {
    %c0_i32 = arith.constant 0 : i32
    %c0_i32_0 = arith.constant 0 : i32
    %c0_i32_1 = arith.constant 0 : i32
    return %c0_i32, %c0_i32_0 : i32, i32
  }
  func.func @transform_4(%arg0: i32) -> (i32, i32) {
    %c0_i32 = arith.constant 0 : i32
    %c0_i32_0 = arith.constant 0 : i32
    %c0_i32_1 = arith.constant 0 : i32
    return %c0_i32, %c0_i32_0 : i32, i32
  }
  func.func @transform_5(%arg0: i32) -> (i32, i32) {
    %c0_i32 = arith.constant 0 : i32
    %c0_i32_0 = arith.constant 0 : i32
    %c0_i32_1 = arith.constant 0 : i32
    return %c0_i32, %c0_i32_0 : i32, i32
  }
  func.func @transform_6(%arg0: i32) -> (i32, i32) {
    %c0_i32 = arith.constant 0 : i32
    %c0_i32_0 = arith.constant 0 : i32
    %c0_i32_1 = arith.constant 0 : i32
    return %c0_i32, %c0_i32_0 : i32, i32
  }
  func.func @transform_7(%arg0: i32) -> (i32, i32) {
    %c0_i32 = arith.constant 0 : i32
    %c0_i32_0 = arith.constant 0 : i32
    return %arg0, %c0_i32 : i32, i32
  }
}

</mosaic_0001>

<bundles_post_ra>
// kernel: tpu_custom_call.1
= control target key start
LH: loop header
LB: loop body
LE: loop exit
PB: predicated region body
PF: predicated region fallthrough
CT: control target
= control target key end

     0   :  { %12 = vsyncpa [#allocation3], 0  ;;  %s823_s0 = inlined_call_operand.hbm [shape: f32[8,32], index: 0, kind: input, shape index: {}]   ;;  %s824_s1 = inlined_call_operand.hbm [shape: bf16[32,128], index: 1, kind: input, shape index: {}]   ;;  %s825_s2 = inlined_call_operand.vmem [shape: f32[1,128], index: 2, kind: input, shape index: {}]   ;;  %s826_s3 = inlined_call_operand.hbm [shape: bf16[128,256], index: 3, kind: input, shape index: {}]   ;;  %s827_s4 = inlined_call_operand.vmem [shape: f32[1,256], index: 4, kind: input, shape index: {}]   ;;  %s828_s5 = inlined_call_operand.hbm [shape: bf16[256,128], index: 5, kind: input, shape index: {}]   ;;  %s829_s6 = inlined_call_operand.vmem [shape: f32[1,128], index: 6, kind: input, shape index: {}]   ;;  %s830_s7 = inlined_call_operand.hbm [shape: f32[8,128], index: 7, kind: output, shape index: {}]  }
   0x1   :  { %13 = vsyncpa [#allocation6], 0 }
   0x2   :  { %14 = vsyncpa [#allocation9], 0  ;;  %s31_s26 = sshll.u32 %s824_s1, 4  ;;  %s32_s26 = int_to_ptr.hbm [resolvable:$true] %s31_s26 }
   0x3   :  { %15 = vsyncpa [#allocation4], 0  ;;  %s750_s27 = smov [#allocation5]   ;;  %s21_s8 = sshll.u32 %s823_s0, 4  ;;  %s22_s8 = int_to_ptr.hbm [resolvable:$true] %s21_s8 }
   0x4   :  { %s33_s28 = sshll.u32 %s750_s27, 4  ;;  %s751_s9 = smov 64   ;;  %s34_s28 = int_to_ptr.vmem [resolvable:$true] %s33_s28 }
   0x5   :  { %s752_s10 = smov 4   ;;  %s753_s11 = smov [#allocation2]  }
   0x6   :  { %39 = dma.hbm_to_vmem [thread:$0]  %s32_s26, 256, %s34_s28, [#allocation6], %s751_s9, %s751_s9, %s752_s10  }
   0x7   :  { %s23_s12 = sshll.u32 %s753_s11, 4  ;;  %s46_s15 = sshll.u32 %s826_s3, 4  ;;  %s24_s12 = int_to_ptr.vmem [resolvable:$true] %s23_s12  ;;  %s47_s15 = int_to_ptr.hbm [resolvable:$true] %s46_s15 }
   0x8   :  { %26 = dma.hbm_to_vmem [thread:$0]  %s22_s8, 128, %s24_s12, [#allocation3]  }
   0x9   :  { %s754_s1 = smov [#allocation7]   ;;  %s61_s0 = sshll.u32 %s828_s5, 4  ;;  %s62_s0 = int_to_ptr.hbm [resolvable:$true] %s61_s0 }
   0xa   :  { %s48_s16 = sshll.u32 %s754_s1, 4  ;;  %s755_s19 = smov 128   ;;  %s49_s16 = int_to_ptr.vmem [resolvable:$true] %s48_s16 }
   0xb   :  { %s756_s20 = smov 8   ;;  %s757_s21 = smov [#allocation8]  }
   0xc   :  { %54 = dma.hbm_to_vmem [thread:$0]  %s47_s15, 2048, %s49_s16, [#allocation6], %s755_s19, %s755_s19, %s756_s20  }
   0xd   :  { %s63_s22 = sshll.u32 %s757_s21, 4  ;;  %s64_s22 = int_to_ptr.vmem [resolvable:$true] %s63_s22 }
   0xe   :  { %69 = dma.hbm_to_vmem [thread:$0]  %s62_s0, 2048, %s64_s22, [#allocation9], %s751_s9, %s751_s9, %s752_s10  }
   0xf   :  { %742 = dma.done.wait [#allocation3], 128  }
  0x10   :  { %743 = vsyncadd [#allocation3], 4294967168 }
  0x11   :  { %744 = dma.done.wait [#allocation6], 2304  }
  0x12   :  { %745 = vsyncadd [#allocation6], 4294964992 }
  0x13   :  { %746 = dma.done.wait [#allocation9], 2048  }
  0x14   :  { %747 = vsyncadd [#allocation9], 4294965248  ;;  %v578_v0 = vld [vmem:[#allocation5 + $0x8] sm:$0xff]  ;;  %v577_v1 = vld [vmem:[#allocation5] sm:$0xff]  ;;  %vm111_vm0 = vcmask 261120   ;;  %s428_s29 = sshll.u32 %s830_s7, 4  ;;  %s429_s29 = int_to_ptr.hbm [resolvable:$true] %s428_s29 }
  0x15   :  { %v89_v2 = vld [vmem:[#allocation2] sm:$0xff]  ;;  %v507_v3 = vld [vmem:[#allocation7 + $0x70] sm:$0xf]  ;;  %v594_v4 = vld [vmem:[#allocation7 + $0x74] sm:$0xf0]  ;;  %121 = vmatpush.bf16.msra.mxu0 %v578_v0 }
  0x16   :  { %v593_v5 = vld [vmem:[#allocation7 + $0x74] sm:$0xf]  ;;  %v508_v6 = vor.u32 %v594_v4, %v507_v3  ;;  %v509_v7 = vld [vmem:[#allocation7 + $0x78] sm:$0xf0]  ;;  %v499_v8 = vld [vmem:[#allocation7 + $0x60] sm:$0xf]  ;;  %v90_v14 = vpack.c.bf16 %v89_v2, %v89_v2 }
  0x17   :  { %v592_v9 = vld [vmem:[#allocation7 + $0x64] sm:$0xf0]  ;;  %v512_v10 = vor.u32 %v593_v5, %v509_v7  ;;  %v591_v11 = vld [vmem:[#allocation7 + $0x64] sm:$0xf]  ;;  %v501_v12 = vld [vmem:[#allocation7 + $0x68] sm:$0xf0] }
  0x18   :  { %232 = vmatpush.bf16.msra.mxu1 %v508_v6  ;;  %v500_v13 = vor.u32 %v592_v9, %v499_v8  ;;  %v504_v15 = vor.u32 %v591_v11, %v501_v12  ;;  %v491_v16 = vld [vmem:[#allocation7 + $0x50] sm:$0xf]  ;;  %v590_v17 = vld [vmem:[#allocation7 + $0x54] sm:$0xf0]  ;;  %v589_v18 = vld [vmem:[#allocation7 + $0x54] sm:$0xf] }
  0x19   :  { %245 = vmatpush.bf16.msra.mxu2 %v512_v10  ;;  %122 = vmatpush.bf16.msra.mxu0 %v577_v1  ;;  %v493_v19 = vld [vmem:[#allocation7 + $0x58] sm:$0xf0]  ;;  %v492_v20 = vor.u32 %v590_v17, %v491_v16  ;;  %v483_v21 = vld [vmem:[#allocation7 + $0x40] sm:$0xf]  ;;  %v588_v23 = vld [vmem:[#allocation7 + $0x44] sm:$0xf0] }
  0x1a   :  { %v496_v22 = vor.u32 %v589_v18, %v493_v19  ;;  %v587_v24 = vld [vmem:[#allocation7 + $0x44] sm:$0xf]  ;;  %v485_v25 = vld [vmem:[#allocation7 + $0x48] sm:$0xf0]  ;;  %v484_v26 = vor.u32 %v588_v23, %v483_v21  ;;  %v475_v28 = vld [vmem:[#allocation7 + $0x30] sm:$0xf] }
  0x1b   :  { %v488_v27 = vor.u32 %v587_v24, %v485_v25  ;;  %v586_v29 = vld [vmem:[#allocation7 + $0x34] sm:$0xf0]  ;;  %v585_v30 = vld [vmem:[#allocation7 + $0x34] sm:$0xf]  ;;  %v477_v31 = vld [vmem:[#allocation7 + $0x38] sm:$0xf0] }
  0x1c   :  { %233 = vmatpush.bf16.msra.mxu1 %v500_v13  ;;  %448 = vmatmul.msk.bf16.vlgmr.msra.gmra.mxu0 %vm111_vm0, %v90_v14  ;;  %v476_v32 = vor.u32 %v586_v29, %v475_v28  ;;  %v480_v33 = vor.u32 %v585_v30, %v477_v31  ;;  %v467_v34 = vld [vmem:[#allocation7 + $0x20] sm:$0xf]  ;;  %v584_v35 = vld [vmem:[#allocation7 + $0x24] sm:$0xf0]  ;;  %v583_v36 = vld [vmem:[#allocation7 + $0x24] sm:$0xf] }
  0x1d   :  { %246 = vmatpush.bf16.msra.mxu2 %v504_v15  ;;  %v469_v37 = vld [vmem:[#allocation7 + $0x28] sm:$0xf0]  ;;  %v468_v38 = vor.u32 %v584_v35, %v467_v34  ;;  %v459_v40 = vld [vmem:[#allocation7 + $0x10] sm:$0xf]  ;;  %v582_v41 = vld [vmem:[#allocation7 + $0x14] sm:$0xf0] }
  0x1e   :  { %v472_v39 = vor.u32 %v583_v36, %v469_v37  ;;  %v581_v42 = vld [vmem:[#allocation7 + $0x14] sm:$0xf]  ;;  %v460_v43 = vor.u32 %v582_v41, %v459_v40  ;;  %v461_v44 = vld [vmem:[#allocation7 + $0x18] sm:$0xf0]  ;;  %v451_v46 = vld [vmem:[#allocation7] sm:$0xf] }
  0x1f   :  { %v464_v45 = vor.u32 %v581_v42, %v461_v44  ;;  %v580_v47 = vld [vmem:[#allocation7 + $0x4] sm:$0xf0]  ;;  %v579_v48 = vld [vmem:[#allocation7 + $0x4] sm:$0xf]  ;;  %v453_v50 = vld [vmem:[#allocation7 + $0x8] sm:$0xf0] }
  0x20   :  { %234 = vmatpush.bf16.msra.mxu1 %v492_v20  ;;  %v452_v49 = vor.u32 %v580_v47, %v451_v46  ;;  %v456_v51 = vor.u32 %v579_v48, %v453_v50  ;;  %v602_v52 = vld [vmem:[#allocation8 + $0x38] sm:$0xff]  ;;  %v601_v54 = vld [vmem:[#allocation8 + $0x30] sm:$0xff]  ;;  %v600_v56 = vld [vmem:[#allocation8 + $0x28] sm:$0xff] }
  0x21   :  { %247 = vmatpush.bf16.msra.mxu2 %v496_v22  ;;  %v610_v53 = vld [vmem:[#allocation8 + $0x78] sm:$0xff]  ;;  %394 = vmatpush.bf16.msra.mxu3 %v602_v52  ;;  %v609_v55 = vld [vmem:[#allocation8 + $0x70] sm:$0xff]  ;;  %v608_v57 = vld [vmem:[#allocation8 + $0x68] sm:$0xff] }
  0x22   :  { %407 = vmatpush.bf16.msrb.mxu0 %v610_v53  ;;  %v599_v58 = vld [vmem:[#allocation8 + $0x20] sm:$0xff]  ;;  %v598_v60 = vld [vmem:[#allocation8 + $0x18] sm:$0xff]  ;;  %v597_v62 = vld [vmem:[#allocation8 + $0x10] sm:$0xff] }
  0x23   :  { %v607_v59 = vld [vmem:[#allocation8 + $0x60] sm:$0xff]  ;;  %v606_v61 = vld [vmem:[#allocation8 + $0x58] sm:$0xff]  ;;  %v620_v63 = vld [vmem:[%s825_s2] ss:$0 sm:$0xff] }
  0x24   :  { %235 = vmatpush.bf16.msra.mxu1 %v484_v26  ;;  %v596_v5 = vld [vmem:[#allocation8 + $0x8] sm:$0xff]  ;;  %v605_v6 = vld [vmem:[#allocation8 + $0x50] sm:$0xff]  ;;  %v595_v7 = vld [vmem:[#allocation8] sm:$0xff] }
  0x25   :  { %248 = vmatpush.bf16.msra.mxu2 %v488_v27  ;;  %395 = vmatpush.bf16.msra.mxu3 %v601_v54  ;;  %v604_v8 = vld [vmem:[#allocation8 + $0x48] sm:$0xff]  ;;  %v603_v9 = vld [vmem:[#allocation8 + $0x40] sm:$0xff] }
  0x26   :  { %408 = vmatpush.bf16.msrb.mxu0 %v609_v55  ;;  %v146_v10 = vld [vmem:[%s827_s4] sm:$0x3]  ;;  %s758_s4 = smov [#allocation10]  }
  0x27   :  { %v148_v11 = vperm.slane %v146_v10, 0  ;;  %v149_v15 = vperm.slane %v146_v10, 1  ;;  %v621_v23 = vld [vmem:[%s829_s6] ss:$0 sm:$0xff]  ;;  %s426_s26 = sshll.u32 %s758_s4, 4  ;;  %s427_s26 = int_to_ptr.vmem [resolvable:$true] %s426_s26 }
  0x28   :  { %236 = vmatpush.bf16.msra.mxu1 %v476_v32 }
  0x29   :  { %249 = vmatpush.bf16.msra.mxu2 %v480_v33  ;;  %396 = vmatpush.bf16.msra.mxu3 %v600_v56 }
  0x2a   :  { %409 = vmatpush.bf16.msrb.mxu0 %v608_v57 }
  0x2c   :  { %237 = vmatpush.bf16.msra.mxu1 %v468_v38 }
  0x2d   :  { %250 = vmatpush.bf16.msra.mxu2 %v472_v39  ;;  %397 = vmatpush.bf16.msra.mxu3 %v599_v58 }
  0x2e   :  { %410 = vmatpush.bf16.msrb.mxu0 %v607_v59 }
  0x30   :  { %238 = vmatpush.bf16.msra.mxu1 %v460_v43 }
  0x31   :  { %251 = vmatpush.bf16.msra.mxu2 %v464_v45  ;;  %398 = vmatpush.bf16.msra.mxu3 %v598_v60 }
  0x32   :  { %411 = vmatpush.bf16.msrb.mxu0 %v606_v61 }
  0x34   :  { %239 = vmatpush.bf16.msra.mxu1 %v452_v49 }
  0x35   :  { %252 = vmatpush.bf16.msra.mxu2 %v456_v51  ;;  %399 = vmatpush.bf16.msra.mxu3 %v597_v62 }
  0x36   :  { %412 = vmatpush.bf16.msrb.mxu0 %v605_v6 }
  0x39   :  { %400 = vmatpush.bf16.msra.mxu3 %v596_v5 }
  0x3a   :  { %413 = vmatpush.bf16.msrb.mxu0 %v604_v8 }
  0x3d   :  { %401 = vmatpush.bf16.msra.mxu3 %v595_v7 }
  0x3e   :  { %414 = vmatpush.bf16.msrb.mxu0 %v603_v9 }
  0x99   :  { %v124_v0 = vpop.f32.mrf.mxu0 }
  0x9a   :  { %v125_v1 = vadd.f32 %v620_v63, %v124_v0 }
  0x9c   :  { %v128_v2 = vmax.f32 %v125_v1, 0.0 }
  0x9e   :  { %v129_v3 = vpack.c.bf16 %v128_v2, %v128_v2 }
  0xa0   :  { %240 = vmatmul.bf16.vlgmr.msra.gmra.mxu1 %v129_v3  ;;  %253 = vmatmul.bf16.vlgmr.msra.gmra.mxu2 %v129_v3 }
  0xa1   :  { %v126_v4 = vpop.f32.mrf.mxu0 }
 0x11d   :  { %v241_v12 = vpop.f32.mrf.mxu1 }
 0x11e   :  { %v242_v13 = vadd.f32 %v241_v12, %v148_v11 }
 0x120   :  { %v258_v14 = vmax.f32 %v242_v13, 0.0 }
 0x122   :  { %v260_v16 = vpack.c.bf16 %v258_v14, %v258_v14 }
 0x123   :  { %v254_v17 = vpop.f32.mrf.mxu2 }
 0x124   :  { %v255_v18 = vadd.f32 %v254_v17, %v149_v15  ;;  %402 = vmatmul.bf16.vlgmr.msra.gmra.mxu3 %v260_v16 }
 0x125   :  { %v243_v19 = vpop.f32.mrf.mxu1 }
 0x126   :  { %v259_v20 = vmax.f32 %v255_v18, 0.0 }
 0x128   :  { %v261_v21 = vpack.c.bf16 %v259_v20, %v259_v20 }
 0x12a   :  { %415 = vmatmul.bf16.vlgmr.msrb.gmra.mxu0 %v261_v21 }
 0x12b   :  { %v256_v22 = vpop.f32.mrf.mxu2 }
 0x1a7   :  { %v403_v24 = vpop.f32.mrf.mxu3  ;;  %v416_v25 = vpop.f32.mrf.mxu0 }
 0x1a8   :  { %v404_v26 = vadd.f32 %v621_v23, %v403_v24 }
 0x1aa   :  { %v417_v27 = vadd.f32 %v416_v25, %v404_v26 }
 0x1ac   :  { %420 = vst [vmem:[#allocation10] sm:$0xff] %v417_v27 }
 0x1ad   :  { %431 = dma.vmem_to_hbm [thread:$0]  %s427_s26, 128, %s429_s29, [#allocation4]  }
 0x1af   :  { %v405_v28 = vpop.f32.mrf.mxu3  ;;  %v418_v29 = vpop.f32.mrf.mxu0 }
 0x1b0   :  { %748 = dma.done.wait [#allocation4], 128  }
 0x1b1   :  { %749 = vsyncadd [#allocation4], 4294967168 }
 0x1b2   :  { %436 = vsyncpa [#allocation3], 1 }
 0x1b3   :  { %437 = vsyncpa [#allocation6], 1 }
 0x1b4   :  { %438 = vsyncpa [#allocation9], 1 }
 0x1b5   :  { %439 = vsyncpa [#allocation4], 1 }

</bundles_post_ra>
